<compile_context>
chip_gen: v7x
topology: tpu7x:2x2x1
jax: 0.10.0
libtpu: 0.0.40
codegen_flags: <defaults>
</compile_context>

<pallas_src>
import functools

import jax
import jax.numpy as jnp
from jax.experimental import pallas as pl
from jax.experimental.pallas import tpu as pltpu

NORM_EPS = 1e-12  # F.normalize default eps


# ----------------------------------------------------------------------------
# Kernel 1: fused avg / max / GeM global pooling, streamed over spatial tiles.
# ----------------------------------------------------------------------------
def cgd_pool_kernel(x_ref, avg_ref, max_ref, gem_ref,
                    sum_acc, max_acc, cube_acc, *, inv_hw, inv_p):
    hw = pl.program_id(1)

    @pl.when(hw == 0)
    def _():
        sum_acc[...] = jnp.zeros_like(sum_acc)
        cube_acc[...] = jnp.zeros_like(cube_acc)
        max_acc[...] = jnp.full_like(max_acc, -jnp.inf)

    x = x_ref[...].astype(jnp.float32)                    # (N, TC, THW)
    # One lane-axis reduce per grid step; accumulation across tiles is VPU.
    sum_acc[...] += jnp.sum(x, axis=-1)
    max_acc[...] = jnp.maximum(max_acc[...], jnp.max(x, axis=-1))
    cube_acc[...] += jnp.sum(x * x * x, axis=-1)          # GeM with p=3

    @pl.when(hw == pl.num_programs(1) - 1)
    def _():
        avg_ref[...] = (sum_acc[...] * inv_hw).astype(avg_ref.dtype)
        max_ref[...] = max_acc[...].astype(max_ref.dtype)
        m = cube_acc[...] * inv_hw
        # m^(1/p) via EUP exp/log (inputs are non-negative post-ReLU features).
        gem_ref[...] = jnp.exp(jnp.log(m) * inv_p).astype(gem_ref.dtype)


# ----------------------------------------------------------------------------
# Kernel 2: per-descriptor Linear (accumulated over K tiles) + L2-normalize
#           + final bias-free Linear, fused.
# ----------------------------------------------------------------------------
def cgd_head_kernel(ps_ref, pm_ref, pg_ref, ws_ref, wm_ref, wg_ref,
                    b_ref, wfc_ref, feat_ref, acc_s, acc_m, acc_g):
    k = pl.program_id(0)

    @pl.when(k == 0)
    def _():
        acc_s[...] = jnp.zeros_like(acc_s)
        acc_m[...] = jnp.zeros_like(acc_m)
        acc_g[...] = jnp.zeros_like(acc_g)

    acc_s[...] += jnp.dot(ps_ref[...], ws_ref[...],
                          preferred_element_type=jnp.float32)
    acc_m[...] += jnp.dot(pm_ref[...], wm_ref[...],
                          preferred_element_type=jnp.float32)
    acc_g[...] += jnp.dot(pg_ref[...], wg_ref[...],
                          preferred_element_type=jnp.float32)

    @pl.when(k == pl.num_programs(0) - 1)
    def _():
        d_s = acc_s[...] + b_ref[0]                       # (N, dim)
        d_m = acc_m[...] + b_ref[1]
        d_g = acc_g[...] + b_ref[2]

        def _l2norm(d):
            nrm = jnp.sqrt(jnp.sum(d * d, axis=-1, keepdims=True))
            return d / jnp.maximum(nrm, NORM_EPS)

        d_s = _l2norm(d_s)
        d_m = _l2norm(d_m)
        d_g = _l2norm(d_g)

        feat = (jnp.dot(d_s, wfc_ref[0], preferred_element_type=jnp.float32)
                + jnp.dot(d_m, wfc_ref[1], preferred_element_type=jnp.float32)
                + jnp.dot(d_g, wfc_ref[2], preferred_element_type=jnp.float32))
        feat_ref[...] = feat.astype(feat_ref.dtype)


# ----------------------------------------------------------------------------
# Tile-size selection (lane-dense, VMEM-budgeted; full dim when not tileable).
# ----------------------------------------------------------------------------
def _pick_c_tile(C):
    if C % 256 == 0 and C > 256:
        return 256
    if C % 128 == 0 and C > 128:
        return 128
    return C


def _pick_hw_tile(HW, N, TC, budget_bytes=2 << 20):
    if HW % 128 != 0:
        return HW                       # block must equal full array dim
    cap = max(128, (budget_bytes // (4 * N * TC)) // 128 * 128)
    for cand in (2048, 1024, 512, 256, 128):
        if cand <= cap and HW % cand == 0:
            return cand
    return 128


def _pick_k_tile(C):
    for cand in (512, 256, 128):
        if C % cand == 0 and C > cand:
            return cand
    return C


# ----------------------------------------------------------------------------
# Wrapper
# ----------------------------------------------------------------------------
def cgd_forward(x_nchw, w_s, b_s, w_m, b_m, w_g, b_g, w_fc,
                *, p=3, hw_block=None, c_block=None, k_block=None):
    """CGD forward.

    x_nchw : (N, C, H, W) f32 (non-negative, e.g. post-ReLU backbone features)
    w_*    : (C, dim) reduction weights (already transposed vs. torch layout)
    b_*    : (dim,) reduction biases
    w_fc   : (3*dim, out_features) bias-free fc weight (transposed vs. torch)
    Returns (feat (N, out_features), aux (N, C)).
    """
    N, C, H, W = x_nchw.shape
    HW = H * W
    dim = w_s.shape[1]
    out_features = w_fc.shape[1]
    assert w_fc.shape[0] == 3 * dim

    x = x_nchw.reshape(N, C, HW)          # free reshape (NCHW layout)

    TC = c_block if c_block is not None else _pick_c_tile(C)
    THW = hw_block if hw_block is not None else _pick_hw_tile(HW, N, TC)
    assert C % TC == 0 and HW % THW == 0

    pool_cost = pl.CostEstimate(
        flops=6 * N * C * HW,
        transcendentals=2 * N * C,
        bytes_accessed=4 * (N * C * HW + 3 * N * C),
    )

    avg_p, max_p, gem_p = pl.pallas_call(
        functools.partial(cgd_pool_kernel,
                          inv_hw=1.0 / float(HW), inv_p=1.0 / float(p)),
        out_shape=(
            jax.ShapeDtypeStruct((N, C), jnp.float32),
            jax.ShapeDtypeStruct((N, C), jnp.float32),
            jax.ShapeDtypeStruct((N, C), jnp.float32),
        ),
        grid=(C // TC, HW // THW),
        in_specs=[pl.BlockSpec((N, TC, THW), lambda c, h: (0, c, h))],
        out_specs=(
            pl.BlockSpec((N, TC), lambda c, h: (0, c)),
            pl.BlockSpec((N, TC), lambda c, h: (0, c)),
            pl.BlockSpec((N, TC), lambda c, h: (0, c)),
        ),
        scratch_shapes=[
            pltpu.VMEM((N, TC), jnp.float32),
            pltpu.VMEM((N, TC), jnp.float32),
            pltpu.VMEM((N, TC), jnp.float32),
        ],
        compiler_params=pltpu.CompilerParams(
            dimension_semantics=("parallel", "arbitrary"),
        ),
        cost_estimate=pool_cost,
    )(x)

    # ---- head: three reductions + normalize + fc, tiled over in_features ----
    TK = k_block if k_block is not None else _pick_k_tile(C)
    assert C % TK == 0

    bias = jnp.stack([b_s, b_m, b_g]).reshape(3, 1, dim)
    wfc3 = w_fc.reshape(3, dim, out_features)

    head_cost = pl.CostEstimate(
        flops=2 * N * C * dim * 3 + 2 * N * 3 * dim * out_features,
        transcendentals=3 * N,
        bytes_accessed=4 * (3 * N * C + 3 * C * dim + 3 * dim
                            + 3 * dim * out_features + N * out_features),
    )

    feat = pl.pallas_call(
        cgd_head_kernel,
        out_shape=jax.ShapeDtypeStruct((N, out_features), jnp.float32),
        grid=(C // TK,),
        in_specs=[
            pl.BlockSpec((N, TK), lambda k: (0, k)),
            pl.BlockSpec((N, TK), lambda k: (0, k)),
            pl.BlockSpec((N, TK), lambda k: (0, k)),
            pl.BlockSpec((TK, dim), lambda k: (k, 0)),
            pl.BlockSpec((TK, dim), lambda k: (k, 0)),
            pl.BlockSpec((TK, dim), lambda k: (k, 0)),
            # bias / fc weight: constant index_map -> fetched once, resident.
            pl.BlockSpec((3, 1, dim), lambda k: (0, 0, 0)),
            pl.BlockSpec((3, dim, out_features), lambda k: (0, 0, 0)),
        ],
        out_specs=pl.BlockSpec((N, out_features), lambda k: (0, 0)),
        scratch_shapes=[
            pltpu.VMEM((N, dim), jnp.float32),
            pltpu.VMEM((N, dim), jnp.float32),
            pltpu.VMEM((N, dim), jnp.float32),
        ],
        compiler_params=pltpu.CompilerParams(
            dimension_semantics=("arbitrary",),
        ),
        cost_estimate=head_cost,
    )(avg_p, max_p, gem_p, w_s, w_m, w_g, bias, wfc3)

    aux = avg_p  # config[0] == 'S' -> aux is the flattened avg-pooled features
    return feat, aux


if __name__ == "__main__":
    key = jax.random.PRNGKey(0)
    N, C, H, W = 2, 64, 16, 16          # small in_features / spatial
    out_features = 48
    dim = out_features // 3             # 'SMG' -> 3 descriptors

    ks = jax.random.split(key, 8)
    # CGD consumes post-ReLU backbone features; keep inputs positive so the
    # GeM fractional power is well defined (matches PyTorch behavior).
    x = jax.random.uniform(ks[0], (N, C, H, W), jnp.float32,
                           minval=0.05, maxval=1.0)

    w_s = jax.random.normal(ks[1], (C, dim), jnp.float32) * 0.05
    b_s = jax.random.normal(ks[2], (dim,), jnp.float32) * 0.05
    w_m = jax.random.normal(ks[3], (C, dim), jnp.float32) * 0.05
    b_m = jax.random.normal(ks[4], (dim,), jnp.float32) * 0.05
    w_g = jax.random.normal(ks[5], (C, dim), jnp.float32) * 0.05
    b_g = jax.random.normal(ks[6], (dim,), jnp.float32) * 0.05
    w_fc = jax.random.normal(ks[7], (3 * dim, out_features), jnp.float32) * 0.05

    # hw_block=128 -> HW=256 splits into 2 pipelined spatial steps, exercising
    # the accumulate / pl.when-finalize path even at these small shapes.
    feat, aux = cgd_forward(x, w_s, b_s, w_m, b_m, w_g, b_g, w_fc,
                            hw_block=128)
    jax.block_until_ready((feat, aux))

    # ---- pure-JAX reference ----
    xf = x.reshape(N, C, H * W)
    p_avg = jnp.mean(xf, axis=-1)
    p_max = jnp.max(xf, axis=-1)
    p_gem = jnp.mean(xf ** 3, axis=-1) ** (1.0 / 3.0)

    def l2n(d):
        return d / jnp.maximum(
            jnp.sqrt(jnp.sum(d * d, axis=-1, keepdims=True)), NORM_EPS)

    d_s = l2n(p_avg @ w_s + b_s)
    d_m = l2n(p_max @ w_m + b_m)
    d_g = l2n(p_gem @ w_g + b_g)
    feat_ref = jnp.concatenate([d_s, d_m, d_g], axis=-1) @ w_fc
    aux_ref = p_avg

    assert jnp.allclose(aux, aux_ref, atol=1e-5, rtol=1e-5)
    assert jnp.allclose(feat, feat_ref, atol=1e-4, rtol=1e-4)

    print("KERNEL_OK")
</pallas_src>

<mosaic_0001>
module attributes {stable_mosaic.version = 11 : i64} {
  func.func @cgd_pool_kernel(%arg0: i32, %arg1: i32, %arg2: memref<2x64x128xf32, #tpu.memory_space<vmem>>, %arg3: memref<2x64xf32, #tpu.memory_space<vmem>>, %arg4: memref<2x64xf32, #tpu.memory_space<vmem>>, %arg5: memref<2x64xf32, #tpu.memory_space<vmem>>, %arg6: memref<2x64xf32, #tpu.memory_space<vmem>>, %arg7: memref<2x64xf32, #tpu.memory_space<vmem>>, %arg8: memref<2x64xf32, #tpu.memory_space<vmem>>) attributes {dimension_semantics = [#tpu.dimension_semantics<parallel>, #tpu.dimension_semantics<arbitrary>], iteration_bounds = array<i64: 1, 2>, scalar_prefetch = 0 : i64, scratch_operands = 3 : i64, tpu.core_type = #tpu.core_type<tc>, window_params = [{transform_indices = @transform_0, window_bounds = array<i64: 2, 64, 128>}, {transform_indices = @transform_1, window_bounds = array<i64: 2, 64>}, {transform_indices = @transform_2, window_bounds = array<i64: 2, 64>}, {transform_indices = @transform_3, window_bounds = array<i64: 2, 64>}]} {
    %c0_i32 = arith.constant 0 : i32
    %0 = arith.cmpi eq, %arg1, %c0_i32 : i32
    %1 = arith.extui %0 : i1 to i32
    %c0_i32_0 = arith.constant 0 : i32
    %2 = arith.cmpi ne, %1, %c0_i32_0 : i32
    scf.if %2 {
      %cst_18 = arith.constant 0.000000e+00 : f32
      %21 = vector.broadcast %cst_18 : f32 to vector<2x64xf32>
      %c0_19 = arith.constant 0 : index
      %c0_20 = arith.constant 0 : index
      %22 = vector.load %arg6[%c0_19, %c0_20] : memref<2x64xf32, #tpu.memory_space<vmem>>, vector<2x64xf32>
      tpu.vector_store %arg6[%c0_19, %c0_20], %21 {strides = array<i32>} : memref<2x64xf32, #tpu.memory_space<vmem>>, vector<2x64xf32>,
      %cst_21 = arith.constant 0.000000e+00 : f32
      %23 = vector.broadcast %cst_21 : f32 to vector<2x64xf32>
      %c0_22 = arith.constant 0 : index
      %c0_23 = arith.constant 0 : index
      %24 = vector.load %arg8[%c0_22, %c0_23] : memref<2x64xf32, #tpu.memory_space<vmem>>, vector<2x64xf32>
      tpu.vector_store %arg8[%c0_22, %c0_23], %23 {strides = array<i32>} : memref<2x64xf32, #tpu.memory_space<vmem>>, vector<2x64xf32>,
      %cst_24 = arith.constant 0xFF800000 : f32
      %25 = vector.broadcast %cst_24 : f32 to vector<2x64xf32>
      %c0_25 = arith.constant 0 : index
      %c0_26 = arith.constant 0 : index
      %26 = vector.load %arg7[%c0_25, %c0_26] : memref<2x64xf32, #tpu.memory_space<vmem>>, vector<2x64xf32>
      tpu.vector_store %arg7[%c0_25, %c0_26], %25 {strides = array<i32>} : memref<2x64xf32, #tpu.memory_space<vmem>>, vector<2x64xf32>,
    } else {
    }
    %c0 = arith.constant 0 : index
    %c0_1 = arith.constant 0 : index
    %c0_2 = arith.constant 0 : index
    %3 = vector.load %arg2[%c0, %c0_1, %c0_2] : memref<2x64x128xf32, #tpu.memory_space<vmem>>, vector<2x64x128xf32>
    %c0_3 = arith.constant 0 : index
    %c0_4 = arith.constant 0 : index
    %4 = vector.load %arg6[%c0_3, %c0_4] : memref<2x64xf32, #tpu.memory_space<vmem>>, vector<2x64xf32>
    %cst = arith.constant dense<0.000000e+00> : vector<2x64xf32>
    %5 = vector.multi_reduction <add>, %3, %cst [2] : vector<2x64x128xf32> to vector<2x64xf32>
    %6 = arith.addf %4, %5 : vector<2x64xf32>
    %c0_5 = arith.constant 0 : index
    %c0_6 = arith.constant 0 : index
    %7 = vector.load %arg6[%c0_5, %c0_6] : memref<2x64xf32, #tpu.memory_space<vmem>>, vector<2x64xf32>
    tpu.vector_store %arg6[%c0_5, %c0_6], %6 {strides = array<i32>} : memref<2x64xf32, #tpu.memory_space<vmem>>, vector<2x64xf32>,
    %c0_7 = arith.constant 0 : index
    %c0_8 = arith.constant 0 : index
    %8 = vector.load %arg7[%c0_7, %c0_8] : memref<2x64xf32, #tpu.memory_space<vmem>>, vector<2x64xf32>
    %cst_9 = arith.constant dense<0xFF800000> : vector<2x64xf32>
    %9 = vector.multi_reduction <maximumf>, %3, %cst_9 [2] : vector<2x64x128xf32> to vector<2x64xf32>
    %10 = arith.maximumf %8, %9 : vector<2x64xf32>
    %c0_10 = arith.constant 0 : index
    %c0_11 = arith.constant 0 : index
    %11 = vector.load %arg7[%c0_10, %c0_11] : memref<2x64xf32, #tpu.memory_space<vmem>>, vector<2x64xf32>
    tpu.vector_store %arg7[%c0_10, %c0_11], %10 {strides = array<i32>} : memref<2x64xf32, #tpu.memory_space<vmem>>, vector<2x64xf32>,
    %c0_12 = arith.constant 0 : index
    %c0_13 = arith.constant 0 : index
    %12 = vector.load %arg8[%c0_12, %c0_13] : memref<2x64xf32, #tpu.memory_space<vmem>>, vector<2x64xf32>
    %13 = arith.mulf %3, %3 : vector<2x64x128xf32>
    %14 = arith.mulf %13, %3 : vector<2x64x128xf32>
    %cst_14 = arith.constant dense<0.000000e+00> : vector<2x64xf32>
    %15 = vector.multi_reduction <add>, %14, %cst_14 [2] : vector<2x64x128xf32> to vector<2x64xf32>
    %16 = arith.addf %12, %15 : vector<2x64xf32>
    %c0_15 = arith.constant 0 : index
    %c0_16 = arith.constant 0 : index
    %17 = vector.load %arg8[%c0_15, %c0_16] : memref<2x64xf32, #tpu.memory_space<vmem>>, vector<2x64xf32>
    tpu.vector_store %arg8[%c0_15, %c0_16], %16 {strides = array<i32>} : memref<2x64xf32, #tpu.memory_space<vmem>>, vector<2x64xf32>,
    %c1_i32 = arith.constant 1 : i32
    %18 = arith.cmpi eq, %arg1, %c1_i32 : i32
    %19 = arith.extui %18 : i1 to i32
    %c0_i32_17 = arith.constant 0 : i32
    %20 = arith.cmpi ne, %19, %c0_i32_17 : i32
    scf.if %20 {
      %c0_18 = arith.constant 0 : index
      %c0_19 = arith.constant 0 : index
      %21 = vector.load %arg6[%c0_18, %c0_19] : memref<2x64xf32, #tpu.memory_space<vmem>>, vector<2x64xf32>
      %cst_20 = arith.constant 3.906250e-03 : f32
      %22 = vector.broadcast %cst_20 : f32 to vector<2x64xf32>
      %23 = arith.mulf %21, %22 : vector<2x64xf32>
      %c0_21 = arith.constant 0 : index
      %c0_22 = arith.constant 0 : index
      %24 = vector.load %arg3[%c0_21, %c0_22] : memref<2x64xf32, #tpu.memory_space<vmem>>, vector<2x64xf32>
      tpu.vector_store %arg3[%c0_21, %c0_22], %23 {strides = array<i32>} : memref<2x64xf32, #tpu.memory_space<vmem>>, vector<2x64xf32>,
      %c0_23 = arith.constant 0 : index
      %c0_24 = arith.constant 0 : index
      %25 = vector.load %arg7[%c0_23, %c0_24] : memref<2x64xf32, #tpu.memory_space<vmem>>, vector<2x64xf32>
      %c0_25 = arith.constant 0 : index
      %c0_26 = arith.constant 0 : index
      %26 = vector.load %arg4[%c0_25, %c0_26] : memref<2x64xf32, #tpu.memory_space<vmem>>, vector<2x64xf32>
      tpu.vector_store %arg4[%c0_25, %c0_26], %25 {strides = array<i32>} : memref<2x64xf32, #tpu.memory_space<vmem>>, vector<2x64xf32>,
      %c0_27 = arith.constant 0 : index
      %c0_28 = arith.constant 0 : index
      %27 = vector.load %arg8[%c0_27, %c0_28] : memref<2x64xf32, #tpu.memory_space<vmem>>, vector<2x64xf32>
      %cst_29 = arith.constant 3.906250e-03 : f32
      %28 = vector.broadcast %cst_29 : f32 to vector<2x64xf32>
      %29 = arith.mulf %27, %28 : vector<2x64xf32>
      %30 = math.log %29 : vector<2x64xf32>
      %cst_30 = arith.constant 0.333333343 : f32
      %31 = vector.broadcast %cst_30 : f32 to vector<2x64xf32>
      %32 = arith.mulf %30, %31 : vector<2x64xf32>
      %33 = math.exp %32 : vector<2x64xf32>
      %c0_31 = arith.constant 0 : index
      %c0_32 = arith.constant 0 : index
      %34 = vector.load %arg5[%c0_31, %c0_32] : memref<2x64xf32, #tpu.memory_space<vmem>>, vector<2x64xf32>
      tpu.vector_store %arg5[%c0_31, %c0_32], %33 {strides = array<i32>} : memref<2x64xf32, #tpu.memory_space<vmem>>, vector<2x64xf32>,
    } else {
    }
    return
  }
  func.func @transform_0(%arg0: i32, %arg1: i32) -> (i32, i32, i32) {
    %c0_i32 = arith.constant 0 : i32
    %c0_i32_0 = arith.constant 0 : i32
    return %c0_i32, %arg0, %arg1 : i32, i32, i32
  }
  func.func @transform_1(%arg0: i32, %arg1: i32) -> (i32, i32) {
    %c0_i32 = arith.constant 0 : i32
    %c0_i32_0 = arith.constant 0 : i32
    return %c0_i32, %arg0 : i32, i32
  }
  func.func @transform_2(%arg0: i32, %arg1: i32) -> (i32, i32) {
    %c0_i32 = arith.constant 0 : i32
    %c0_i32_0 = arith.constant 0 : i32
    return %c0_i32, %arg0 : i32, i32
  }
  func.func @transform_3(%arg0: i32, %arg1: i32) -> (i32, i32) {
    %c0_i32 = arith.constant 0 : i32
    %c0_i32_0 = arith.constant 0 : i32
    return %c0_i32, %arg0 : i32, i32
  }
}

</mosaic_0001>

<bundles_post_ra>
// kernel: tpu_custom_call.1
= control target key start
LH: loop header
LB: loop body
LE: loop exit
PB: predicated region body
PF: predicated region fallthrough
CT: control target
= control target key end

     0   :  { %9 = vsyncpa [#allocation6], 0  ;;  %s1502_s0 = inlined_call_operand.hbm [shape: f32[2,64,256], index: 0, kind: input, shape index: {}]   ;;  %s1503_s1 = inlined_call_operand.hbm [shape: f32[2,64], index: 1, kind: output, shape index: {0}]   ;;  %s1504_s2 = inlined_call_operand.hbm [shape: f32[2,64], index: 2, kind: output, shape index: {1}]   ;;  %s1505_s3 = inlined_call_operand.hbm [shape: f32[2,64], index: 3, kind: output, shape index: {2}]  }
   0x1   :  { %11 = vsyncpa [#allocation6 + $0x1], 0 }
   0x2   :  { %12 = vsyncpa [#allocation7], 0 }
   0x3   :  { %13 = vsyncpa [#allocation10], 0  ;;  %s1111_s12 = smov 0   ;;  %s1113_s13 = smov 0  }
   0x4   :  { %s1115_s14 = smov 0   ;;  %s1117_s15 = smov 0  }
   0x5   :  { %s1119_s16 = smov 0   ;;  %s1121_s17 = smov 0  }
   0x6 LB: > { %s812_s18 = sadd.s32 4294967295, %s1080_s17   ;;  %s28_s19 = sadd.s32 1, %s1076_s16  ;;  %s1080_s17 = sphi %s1121_s17, %s19_s17   ;;  %s1076_s16 = sphi %s1119_s16, %s1515_s16   ;;  %s1072_s15 = sphi %s1117_s15, %s1514_s15   ;;  %s1068_s14 = sphi %s1115_s14, %s1513_s14   ;;  %s1064_s13 = sphi %s1113_s13, %s1512_s13   ;;  %s1060_s12 = sphi %s1111_s12, %s1511_s12  }
   0x7   : > { %p29_p0 = scmp.ge.s32.totalorder %s28_s19, 2  ;;  %s40_s20 = sadd.s32 1, %s1068_s14 }
   0x8   : > { %p47_p1 = scmp.ne.s32.totalorder %s1068_s14, %s1064_s13  ;;  %p48_p2 = scmp.eq.s32.totalorder %s1080_s17, 0 }
   0x9   : > { %s1517_s19 = smov (%p29_p0, %s28_s19), 0  ;;  %p53_p4 = scmp.ne.s32.totalorder %s1064_s13, %s1060_s12 }
   0xa   : > { %p1147_p3 = por %p48_p2, %p47_p1  ;;  %s36_s22 = ssub.s32 %s1076_s16, %s1517_s19 }
   0xb   : > { %p54_p5 = scmp.eq.s32.totalorder %s812_s18, 0  ;;  %p38_p6 = scmp.eq.s32.totalorder %s36_s22, 0 }
   0xc   : > { %p847_p8 = scmp.lt.s32.totalorder %s1080_s17, 2  ;;  %s155_s25 = sand.u32 1, %s1068_s14  }
   0xd   : > { %p1156_p7 = por %p54_p5, %p53_p4  ;;  %s816_s26 = sshll.u32 %s1076_s16, 7 }
   0xe   : > { %s1162_s24 = scalar_select %p38_p6, %s1068_s14, %s40_s20  }
   0xf   : > { %s815_s27 = sshll.u32 %s155_s25, 7  ;;  %s1169_s30 = scalar_lea.hbm %s1502_s0, %s816_s26 }
  0x10   : > { %s159_s4 = scalar_lea.vmem [#allocation5], %s815_s27  ;;  %p1173_p9 = pnand %p847_p8, %p1147_p3 }
  0x11   : > { %s168_s5 = sshll.u32 %s159_s4, 4  ;;  %s1180_s7 = scalar_lea.sflag [#allocation6], %s155_s25  ;;  %s1177_s5 = int_to_ptr.vmem [resolvable:$true] %s168_s5 }
  0x12   : > { %s914_s8 = scalar_lea.hbm %s1169_s30, 2048  ;;  %p916_p12 = pneg %p1173_p9 }
  0x13   : > { %p915_p11 = scmp.ne.s32.totalorder %s1169_s30, %s914_s8  ;;  %s919_s11 = scalar_lea.hbm %s1502_s0, 4096 }
  0x14   : > { %p920_p1 = scmp.lt.u32.totalorder %s1169_s30, %s1502_s0  ;;  %p921_p2 = scmp.lt.u32.totalorder %s919_s11, %s914_s8 }
  0x15   : > { %p917_p13 = pnand %p916_p12, %p915_p11  ;;  %p923_p4 = scmp.lt.u32.totalorder %s914_s8, %s1169_s30 }
  0x16   : > { %p922_p3 = por %p921_p2, %p920_p1 }
  0x17   : > { %p918_p0 = pneg %p917_p13 }
  0x18   : > { %p924_p5 = por %p923_p4, %p922_p3 }
  0x1a   : > { %p925_p6 = pnand %p924_p5, %p918_p0 }
  0x1c   : > { %928 = shalt.err (!%p925_p6)
}
  0x1d   : > { %s929_s21 = scalar_lea.vmem %s1177_s5, 2048  ;;  %s1082_s22 = smov [#allocation5]  }
  0x1e   : > { %p930_p8 = scmp.ne.s32.totalorder %s1177_s5, %s929_s21  ;;  %s934_s25 = sshll.u32 %s1082_s22, 4  ;;  %s935_s25 = int_to_ptr.vmem [resolvable:$false] %s934_s25 }
  0x1f   : > { %s936_s26 = scalar_lea.vmem %s935_s25, 4096  ;;  %p937_p10 = scmp.lt.s32.totalorder %s1177_s5, %s935_s25 }
  0x20   : > { %p932_p11 = pnand %p930_p8, %p916_p12  ;;  %p938_p1 = scmp.lt.s32.totalorder %s936_s26, %s929_s21 }
  0x22   : > { %p933_p13 = pneg %p932_p11  ;;  %p939_p2 = por %p938_p1, %p937_p10 }
  0x24   : > { %p940_p3 = pnand %p939_p2, %p933_p13 }
  0x26   : > { %943 = shalt.err (!%p940_p3)
}
  0x27   : > { %s1083_s27 = smov 256   ;;  %s1084_s28 = smov 128  }
  0x28   : > { %s1085_s29 = smov 8   ;;  %p176_p12 = scmp.lt.s32.totalorder %s1080_s17, 3 }
  0x29   : > { %846 = dma.hbm_to_vmem [thread:$0]  (!%p1173_p9), %s1169_s30, 2048, %s1177_s5, %s1180_s7, %s1083_s27, %s1084_s28, %s1085_s29  }
  0x2a   : > { %p1509_p0 = scmp.ge.s32.totalorder %s1080_s17, 1 }
  0x2c   : > { %p177_p4 = pnand %p1509_p0, %p176_p12 }
  0x2d   : > { %s182_s4 = sand.u32 (!%p177_p4), 1, %s1064_s13  }
  0x2e   : > { %180 = sbr.rel (%p177_p4) target bundleno = 414 (0x19e), region = 24  ;;  %s818_s8 = sshll.u32 (!%p177_p4), %s182_s4, 7 }
  0x2f   : > { %s183_s9 = scalar_lea.sflag (!%p177_p4), [#allocation6], %s182_s4  ;;  %s1212_s10 = scalar_lea.vmem (!%p177_p4), [#allocation5], %s818_s8 }
  0x35   : > { %1047 = dma.done.wait (%p1156_p7), %s183_s9, 2048  }
  0x36   : > { %1049 = vsyncadd (%p1156_p7), %s183_s9, 4294965248  ;;  %p819_p10 = scmp.ne.s32.totalorder %s1072_s15, 0 }
  0x37   : > { %vm209_vm0 = vcmask (!%p819_p10), 517120   ;;  %v1086_v0 = vmov (!%p819_p10), 0.0   ;;  %v1087_v1 = vmov (!%p819_p10), -inf  }
  0x38   : > { %208 = sbr.rel (%p819_p10) target bundleno = 63 (0x3f), region = 32  ;;  %210 = vst.msk [vmem:[#allocation2] sm:$0x3] (!%p819_p10), %vm209_vm0, %v1086_v0  ;;  %211 = vst.msk [vmem:[#allocation4] sm:$0x3] (!%p819_p10), %vm209_vm0, %v1086_v0 }
  0x39   : > { %212 = vst.msk [vmem:[#allocation3] sm:$0x3] (!%p819_p10), %vm209_vm0, %v1087_v1 }
  0x3f PF: > { %v215_v2 = vld [vmem:[%s1212_s10 + $0x10] sm:$0xff]  ;;  %v213_v3 = vld [vmem:[%s1212_s10] sm:$0xff]  ;;  %v216_v4 = vld [vmem:[%s1212_s10 + $0x18] sm:$0xff]  ;;  %v278_v50 = vlaneseq  ;;  %vm289_vm1 = vcmask 130112   ;;  %vm296_vm2 = vcmask 195712   ;;  %vm303_vm3 = vcmask 261312  }
  0x40   : > { %234 = vadd.xlane.f32.xlu1 %v215_v2  ;;  %230 = vadd.xlane.f32.xlu0 %v213_v3  ;;  %v214_v5 = vld [vmem:[%s1212_s10 + $0x8] sm:$0xff]  ;;  %v217_v7 = vld [vmem:[%s1212_s10 + $0x20] sm:$0xff]  ;;  %v510_v10 = vmul.f32 %v213_v3, %v213_v3  ;;  %v512_v18 = vmul.f32 %v215_v2, %v215_v2  ;;  %v223_v19 = vld [vmem:[%s1212_s10 + $0x50] sm:$0xff]  ;;  %v513_v25 = vmul.f32 %v216_v4, %v216_v4  ;;  %vm310_vm4 = vcmask 326912   ;;  %p820_p7 = scmp.ne.s32.totalorder %s1072_s15, 1 }
  0x41   : > { %v218_v6 = vld [vmem:[%s1212_s10 + $0x28] sm:$0xff]  ;;  %v221_v9 = vld [vmem:[%s1212_s10 + $0x40] sm:$0xff]  ;;  %v511_v11 = vmul.f32 %v214_v5, %v214_v5  ;;  %v520_v21 = vmul.f32 %v223_v19, %v223_v19  ;;  %v224_v23 = vld [vmem:[%s1212_s10 + $0x58] sm:$0xff]  ;;  %v514_v28 = vmul.f32 %v217_v7, %v217_v7  ;;  %v1235_v51 = vand.u32 127, %v278_v50 }
  0x42   : > { %v222_v8 = vld [vmem:[%s1212_s10 + $0x48] sm:$0xff]  ;;  %v526_v12 = vmul.f32 %v510_v10, %v213_v3  ;;  %v518_v15 = vmul.f32 %v221_v9, %v221_v9  ;;  %v528_v20 = vmul.f32 %v512_v18, %v215_v2  ;;  %v521_v24 = vmul.f32 %v224_v23, %v224_v23  ;;  %v225_v29 = vld [vmem:[%s1212_s10 + $0x60] sm:$0xff]  ;;  %v227_v38 = vld [vmem:[%s1212_s10 + $0x70] sm:$0xff] }
  0x43   : > { %v527_v13 = vmul.f32 %v511_v11, %v214_v5  ;;  %v519_v14 = vmul.f32 %v222_v8, %v222_v8  ;;  %v536_v22 = vmul.f32 %v520_v21, %v223_v19  ;;  %v529_v27 = vmul.f32 %v513_v25, %v216_v4  ;;  %v226_v33 = vld [vmem:[%s1212_s10 + $0x68] sm:$0xff]  ;;  %v219_v39 = vld [vmem:[%s1212_s10 + $0x30] sm:$0xff]  ;;  %v228_v44 = vld [vmem:[%s1212_s10 + $0x78] sm:$0xff] }
  0x44   : > { %236 = vadd.xlane.f32.xlu1 %v216_v4  ;;  %232 = vadd.xlane.f32.xlu0 %v214_v5  ;;  %v534_v17 = vmul.f32 %v518_v15, %v221_v9  ;;  %v537_v26 = vmul.f32 %v521_v24, %v224_v23  ;;  %v530_v30 = vmul.f32 %v514_v28, %v217_v7  ;;  %v220_v45 = vld [vmem:[%s1212_s10 + $0x38] sm:$0xff]  ;;  %v1237_v52 = vshrl.u32 %v278_v50, 7 }
  0x45   : > { %v535_v16 = vmul.f32 %v519_v14, %v222_v8  ;;  %v522_v31 = vmul.f32 %v225_v29, %v225_v29  ;;  %v523_v34 = vmul.f32 %v226_v33, %v226_v33  ;;  %v515_v35 = vmul.f32 %v218_v6, %v218_v6 }
  0x46   : > { %v524_v40 = vmul.f32 %v227_v38, %v227_v38  ;;  %v516_v41 = vmul.f32 %v219_v39, %v219_v39  ;;  %v525_v46 = vmul.f32 %v228_v44, %v228_v44  ;;  %v517_v47 = vmul.f32 %v220_v45, %v220_v45 }
  0x47   : > { %v538_v32 = vmul.f32 %v522_v31, %v225_v29  ;;  %v539_v36 = vmul.f32 %v523_v34, %v226_v33  ;;  %v531_v37 = vmul.f32 %v515_v35, %v218_v6  ;;  %v284_v53 = vadd.s32 4294967288, %v1235_v51 }
  0x48   : > { %240 = vadd.xlane.f32.xlu1 %v218_v6  ;;  %238 = vadd.xlane.f32.xlu0 %v217_v7  ;;  %v540_v42 = vmul.f32 %v524_v40, %v227_v38  ;;  %v532_v43 = vmul.f32 %v516_v41, %v219_v39  ;;  %v541_v48 = vmul.f32 %v525_v46, %v228_v44  ;;  %v291_v54 = vadd.s32 4294967280, %v1235_v51 }
  0x49   : > { %v533_v49 = vmul.f32 %v517_v47, %v220_v45  ;;  %v298_v55 = vadd.s32 4294967272, %v1235_v51  ;;  %v1244_v58 = vsub.s32 %v1235_v51, %v1237_v52  ;;  %v1247_v59 = vsub.s32 %v284_v53, %v1237_v52 }
  0x4a   : > { %v312_v60 = vadd.s32 4294967256, %v1235_v51  ;;  %v305_v61 = vadd.s32 4294967264, %v1235_v51  ;;  %v1252_v62 = vsub.s32 %v291_v54, %v1237_v52  ;;  %vm317_vm5 = vcmask 392512  }
  0x4b   : > { %v1255_v63 = vsub.s32 %v298_v55, %v1237_v52  ;;  %v319_v55 = vadd.s32 4294967248, %v1235_v51  ;;  %vm324_vm6 = vcmask 458112   ;;  %vm331_vm7 = vcmask 523712  }
  0x4c   : > { %248 = vadd.xlane.f32.xlu1 %v222_v8  ;;  %246 = vadd.xlane.f32.xlu0 %v221_v9  ;;  %vm372_vm8 = vcmask 1041409   ;;  %vm376_vm9 = vcmask 517120  }
  0x50   : > { %381 = vmax.xlane.f32.xlu1 %v214_v5  ;;  %379 = vmax.xlane.f32.xlu0 %v213_v3  ;;  %v1263_v5 = vsub.s32 %v305_v61, %v1237_v52 }
  0x54   : > { %397 = vmax.xlane.f32.xlu1 %v222_v8  ;;  %395 = vmax.xlane.f32.xlu0 %v221_v9 }
  0x58   : > { %544 = vadd.xlane.f32.xlu1 %v527_v13  ;;  %542 = vadd.xlane.f32.xlu0 %v526_v12 }
  0x5c   : > { %560 = vadd.xlane.f32.xlu1 %v535_v16  ;;  %558 = vadd.xlane.f32.xlu0 %v534_v17 }
  0x60   : > { %383 = vmax.xlane.f32.xlu1 %v215_v2  ;;  %250 = vadd.xlane.f32.xlu0 %v223_v19 }
  0x64   : > { %546 = vadd.xlane.f32.xlu1 %v528_v20  ;;  %399 = vmax.xlane.f32.xlu0 %v223_v19 }
  0x68   : > { %252 = vadd.xlane.f32.xlu1 %v224_v23  ;;  %562 = vadd.xlane.f32.xlu0 %v536_v22 }
  0x6c   : > { %401 = vmax.xlane.f32.xlu1 %v224_v23  ;;  %385 = vmax.xlane.f32.xlu0 %v216_v4  ;;  %v1260_v4 = vsub.s32 %v312_v60, %v1237_v52  ;;  %v326_v60 = vadd.s32 4294967240, %v1235_v51 }
  0x70   : > { %564 = vadd.xlane.f32.xlu1 %v537_v26  ;;  %548 = vadd.xlane.f32.xlu0 %v529_v27 }
  0x74   : > { %387 = vmax.xlane.f32.xlu1 %v217_v7  ;;  %254 = vadd.xlane.f32.xlu0 %v225_v29 }
  0x78   : > { %550 = vadd.xlane.f32.xlu1 %v530_v30  ;;  %403 = vmax.xlane.f32.xlu0 %v225_v29 }
  0x7c   : > { %256 = vadd.xlane.f32.xlu1 %v226_v33  ;;  %566 = vadd.xlane.f32.xlu0 %v538_v32 }
  0x80   : > { %405 = vmax.xlane.f32.xlu1 %v226_v33  ;;  %389 = vmax.xlane.f32.xlu0 %v218_v6 }
  0x84   : > { %568 = vadd.xlane.f32.xlu1 %v539_v36  ;;  %552 = vadd.xlane.f32.xlu0 %v531_v37 }
  0x88   : > { %258 = vadd.xlane.f32.xlu1 %v227_v38  ;;  %242 = vadd.xlane.f32.xlu0 %v219_v39 }
  0x8c   : > { %407 = vmax.xlane.f32.xlu1 %v227_v38  ;;  %391 = vmax.xlane.f32.xlu0 %v219_v39 }
  0x90   : > { %570 = vadd.xlane.f32.xlu1 %v540_v42  ;;  %554 = vadd.xlane.f32.xlu0 %v532_v43 }
  0x94   : > { %260 = vadd.xlane.f32.xlu1 %v228_v44  ;;  %244 = vadd.xlane.f32.xlu0 %v220_v45 }
  0x98   : > { %409 = vmax.xlane.f32.xlu1 %v228_v44  ;;  %393 = vmax.xlane.f32.xlu0 %v220_v45 }
  0x9c   : > { %572 = vadd.xlane.f32.xlu1 %v541_v48  ;;  %556 = vadd.xlane.f32.xlu0 %v533_v49 }
  0xcd   : > { %v235_v56 = vpop.xlane.xlu1 %234  ;;  %v231_v57 = vpop.xlane.xlu0 %230 }
  0xce   : > { %v283_v2 = vrot.slane %v231_v57, %v1244_v58  ;;  %v295_v6 = vrot.slane %v235_v56, %v1252_v62 }
  0xd1   : > { %v237_v0 = vpop.xlane.xlu1 %236  ;;  %v233_v1 = vpop.xlane.xlu0 %232 }
  0xd2   : > { %v288_v3 = vrot.slane %v233_v1, %v1247_v59  ;;  %v302_v7 = vrot.slane %v237_v0, %v1255_v63  ;;  %v1307_v1 = vsub.s32 %v319_v55, %v1237_v52 }
  0xd4   : > { %v290_v8 = vsel %vm289_vm1, %v288_v3, %v283_v2 }
  0xd5   : > { %v297_v9 = vsel %vm296_vm2, %v295_v6, %v290_v8  ;;  %v241_v10 = vpop.xlane.xlu1 %240  ;;  %v239_v11 = vpop.xlane.xlu0 %238 }
  0xd6   : > { %v316_v12 = vrot.slane %v241_v10, %v1260_v4  ;;  %v304_v13 = vsel %vm303_vm3, %v302_v7, %v297_v9  ;;  %v309_v14 = vrot.slane %v239_v11, %v1263_v5  ;;  %v1320_v11 = vsub.s32 %v326_v60, %v1237_v52 }
  0xd8   : > { %v311_v15 = vsel %vm310_vm4, %v309_v14, %v304_v13 }
  0xd9   : > { %v249_v16 = vpop.xlane.xlu1 %248  ;;  %v247_v17 = vpop.xlane.xlu0 %246  ;;  %v1274_v18 = vsel %vm317_vm5, %v316_v12, %v311_v15 }
  0xda   : > { %v340_v19 = vrot.slane %v249_v16, %v1247_v59  ;;  %v336_v20 = vrot.slane %v247_v17, %v1244_v58 }
  0xdc   : > { %v1279_v21 = vsel %vm289_vm1, %v340_v19, %v336_v20 }
  0xdd   : > { %v382_v22 = vpop.xlane.xlu1 %381  ;;  %v380_v23 = vpop.xlane.xlu0 %379 }
  0xde   : > { %v434_v24 = vrot.slane %v382_v22, %v1247_v59  ;;  %v430_v25 = vrot.slane %v380_v23, %v1244_v58 }
  0xe0   : > { %v435_v26 = vsel %vm289_vm1, %v434_v24, %v430_v25 }
  0xe1   : > { %v398_v27 = vpop.xlane.xlu1 %397  ;;  %v396_v28 = vpop.xlane.xlu0 %395 }
  0xe2   : > { %v473_v61 = vrot.slane %v398_v27, %v1247_v59  ;;  %v469_v0 = vrot.slane %v396_v28, %v1244_v58 }
  0xe5   : > { %v545_v29 = vpop.xlane.xlu1 %544  ;;  %v543_v30 = vpop.xlane.xlu0 %542 }
  0xe6   : > { %v597_v2 = vrot.slane %v545_v29, %v1247_v59  ;;  %v593_v3 = vrot.slane %v543_v30, %v1244_v58 }
  0xe8   : > { %v598_v16 = vsel %vm289_vm1, %v597_v2, %v593_v3 }
  0xe9   : > { %v561_v31 = vpop.xlane.xlu1 %560  ;;  %v559_v32 = vpop.xlane.xlu0 %558 }
  0xea   : > { %v636_v6 = vrot.slane %v561_v31, %v1247_v59  ;;  %v632_v7 = vrot.slane %v559_v32, %v1244_v58  ;;  %v474_v58 = vsel %vm289_vm1, %v473_v61, %v469_v0 }
  0xec   : > { %v637_v17 = vsel %vm289_vm1, %v636_v6, %v632_v7 }
  0xed   : > { %v384_v33 = vpop.xlane.xlu1 %383  ;;  %v251_v34 = vpop.xlane.xlu0 %250 }
  0xee   : > { %v439_v8 = vrot.slane %v384_v33, %v1252_v62  ;;  %v345_v9 = vrot.slane %v251_v34, %v1252_v62 }
  0xf0   : > { %v440_v20 = vsel %vm296_vm2, %v439_v8, %v435_v26  ;;  %v346_v22 = vsel %vm296_vm2, %v345_v9, %v1279_v21 }
  0xf1   : > { %v547_v35 = vpop.xlane.xlu1 %546  ;;  %v400_v36 = vpop.xlane.xlu0 %399 }
  0xf2   : > { %v602_v12 = vrot.slane %v547_v35, %v1252_v62  ;;  %v478_v13 = vrot.slane %v400_v36, %v1252_v62 }
  0xf4   : > { %v603_v27 = vsel %vm296_vm2, %v602_v12, %v598_v16  ;;  %v479_v28 = vsel %vm296_vm2, %v478_v13, %v474_v58  ;;  %v378_v13 = vld [vmem:[#allocation3] sm:$0x3] }
  0xf5   : > { %v253_v37 = vpop.xlane.xlu1 %252  ;;  %v563_v38 = vpop.xlane.xlu0 %562 }
  0xf6   : > { %v350_v59 = vrot.slane %v253_v37, %v1255_v63  ;;  %v641_v14 = vrot.slane %v563_v38, %v1252_v62 }
  0xf8   : > { %v351_v29 = vsel %vm303_vm3, %v350_v59, %v346_v22  ;;  %v642_v21 = vsel %vm296_vm2, %v641_v14, %v637_v17 }
  0xf9   : > { %v402_v39 = vpop.xlane.xlu1 %401  ;;  %v386_v40 = vpop.xlane.xlu0 %385 }
  0xfa   : > { %v483_v15 = vrot.slane %v402_v39, %v1255_v63  ;;  %v444_v52 = vrot.slane %v386_v40, %v1255_v63 }
  0xfc   : > { %v484_v30 = vsel %vm303_vm3, %v483_v15, %v479_v28  ;;  %v445_v33 = vsel %vm303_vm3, %v444_v52, %v440_v20 }
  0xfd   : > { %v565_v41 = vpop.xlane.xlu1 %564  ;;  %v1284_v42 = vpop.xlane.xlu0 %548 }
  0xfe   : > { %v646_v19 = vrot.slane %v565_v41, %v1255_v63  ;;  %v607_v35 = vrot.slane %v1284_v42, %v1255_v63 }
 0x100   : > { %v647_v34 = vsel %vm303_vm3, %v646_v19, %v642_v21  ;;  %v608_v59 = vsel %vm303_vm3, %v607_v35, %v603_v27 }
 0x101   : > { %v388_v43 = vpop.xlane.xlu1 %387  ;;  %v255_v44 = vpop.xlane.xlu0 %254 }
 0x102   : > { %v449_v23 = vrot.slane %v388_v43, %v1263_v5  ;;  %v355_v62 = vrot.slane %v255_v44, %v1263_v5 }
 0x104   : > { %v450_v37 = vsel %vm310_vm4, %v449_v23, %v445_v33  ;;  %v356_v38 = vsel %vm310_vm4, %v355_v62, %v351_v29 }
 0x105   : > { %v1286_v45 = vpop.xlane.xlu1 %550  ;;  %v1288_v46 = vpop.xlane.xlu0 %403 }
 0x106   : > { %v488_v36 = vrot.slane %v1288_v46, %v1263_v5  ;;  %v612_v44 = vrot.slane %v1286_v45, %v1263_v5 }
 0x108   : > { %v489_v45 = vsel %vm310_vm4, %v488_v36, %v484_v30  ;;  %v613_v14 = vsel %vm310_vm4, %v612_v44, %v608_v59 }
 0x109   : > { %v1290_v47 = vpop.xlane.xlu1 %256  ;;  %v1292_v48 = vpop.xlane.xlu0 %566 }
 0x10a   : > { %v360_v26 = vrot.slane %v1290_v47, %v1260_v4 }
 0x10c   : > { %v361_v63 = vsel %vm317_vm5, %v360_v26, %v356_v38 }
 0x10d   : > { %v1294_v49 = vpop.xlane.xlu1 %405  ;;  %v1296_v50 = vpop.xlane.xlu0 %389 }
 0x10e   : > { %v493_v39 = vrot.slane %v1294_v49, %v1260_v4  ;;  %v454_v40 = vrot.slane %v1296_v50, %v1260_v4 }
 0x110   : > { %v494_v0 = vsel %vm317_vm5, %v493_v39, %v489_v45 }
 0x111   : > { %v1298_v53 = vpop.xlane.xlu1 %568  ;;  %v1300_v54 = vpop.xlane.xlu0 %552 }
 0x112   : > { %v656_v2 = vrot.slane %v1298_v53, %v1260_v4  ;;  %v617_v8 = vrot.slane %v1300_v54, %v1260_v4 }
 0x115   : > { %v259_v56 = vpop.xlane.xlu1 %258  ;;  %v243_v57 = vpop.xlane.xlu0 %242 }
 0x116   : > { %v365_v31 = vrot.slane %v259_v56, %v1307_v1  ;;  %v323_v32 = vrot.slane %v243_v57, %v1307_v1  ;;  %v229_v56 = vld [vmem:[#allocation2] sm:$0x3]  ;;  %v651_v57 = vrot.slane %v1292_v48, %v1263_v5 }
 0x118   : > { %v366_v47 = vsel %vm324_vm6, %v365_v31, %v361_v63  ;;  %v325_v55 = vsel %vm324_vm6, %v323_v32, %v1274_v18  ;;  %v455_v18 = vsel %vm317_vm5, %v454_v40, %v450_v37  ;;  %v652_v4 = vsel %vm310_vm4, %v651_v57, %v647_v34 }
 0x119   : > { %v1315_v51 = vpop.xlane.xlu1 %407  ;;  %v1317_v10 = vpop.xlane.xlu0 %391  ;;  %v657_v15 = vsel %vm317_vm5, %v656_v2, %v652_v4 }
 0x11a   : > { %v498_v49 = vrot.slane %v1315_v51, %v1307_v1  ;;  %v459_v50 = vrot.slane %v1317_v10, %v1307_v1 }
 0x11c   : > { %v499_v51 = vsel %vm324_vm6, %v498_v49, %v494_v0  ;;  %v460_v10 = vsel %vm324_vm6, %v459_v50, %v455_v18 }
 0x11d   : > { %v1337_v24 = vpop.xlane.xlu1 %570  ;;  %v1339_v25 = vpop.xlane.xlu0 %554 }
 0x11e   : > { %v661_v12 = vrot.slane %v1337_v24, %v1307_v1  ;;  %v622_v53 = vrot.slane %v1339_v25, %v1307_v1  ;;  %v618_v1 = vsel %vm317_vm5, %v617_v8, %v613_v14  ;;  %v509_v24 = vld [vmem:[#allocation4] sm:$0x3] }
 0x120   : > { %v662_v23 = vsel %vm324_vm6, %v661_v12, %v657_v15  ;;  %v623_v62 = vsel %vm324_vm6, %v622_v53, %v618_v1 }
 0x121   : > { %v261_v41 = vpop.xlane.xlu1 %260  ;;  %v245_v43 = vpop.xlane.xlu0 %244 }
 0x122   : > { %v370_v42 = vrot.slane %v261_v41, %v1320_v11  ;;  %v330_v46 = vrot.slane %v245_v43, %v1320_v11 }
 0x124   : > { %v371_v60 = vsel %vm331_vm7, %v370_v42, %v366_v47  ;;  %v332_v61 = vsel %vm331_vm7, %v330_v46, %v325_v55 }
 0x125   : > { %v373_v3 = vsel %vm372_vm8, %v371_v60, %v332_v61  ;;  %v410_v6 = vpop.xlane.xlu1 %409  ;;  %v394_v7 = vpop.xlane.xlu0 %393 }
 0x126   : > { %v375_v9 = vadd.f32 %v373_v3, %v229_v56  ;;  %v503_v5 = vrot.slane %v410_v6, %v1320_v11  ;;  %v464_v48 = vrot.slane %v394_v7, %v1320_v11 }
 0x128   : > { %377 = vst.msk [vmem:[#allocation2] sm:$0x3] %vm376_vm9, %v375_v9  ;;  %v504_v54 = vsel %vm331_vm7, %v503_v5, %v499_v51  ;;  %v465_v58 = vsel %vm331_vm7, %v464_v48, %v460_v10 }
 0x129   : > { %v505_v16 = vsel %vm372_vm8, %v504_v54, %v465_v58  ;;  %v573_v17 = vpop.xlane.xlu1 %572  ;;  %v557_v52 = vpop.xlane.xlu0 %556 }
 0x12a   : > { %v507_v19 = vmax.f32 %v378_v13, %v505_v16  ;;  %v666_v20 = vrot.slane %v573_v17, %v1320_v11  ;;  %v627_v22 = vrot.slane %v557_v52, %v1320_v11  ;;  %675 = sbr.rel (%p820_p7) target bundleno = 343 (0x157), region = 36 }
 0x12c   : > { %508 = vst.msk [vmem:[#allocation3] sm:$0x3] %vm376_vm9, %v507_v19  ;;  %v667_v25 = vsel %vm331_vm7, %v666_v20, %v662_v23  ;;  %v628_v27 = vsel %vm331_vm7, %v627_v22, %v623_v62 }
 0x12d   : > { %v668_v28 = vsel %vm372_vm8, %v667_v25, %v628_v27 }
 0x12e   : > { %v670_v29 = vadd.f32 %v668_v28, %v509_v24 }
 0x12f   : > { %v676_v11 = vld [vmem:[#allocation2] sm:$0x3] (!%p820_p7) }
 0x130   : > { %671 = vst.msk [vmem:[#allocation4] sm:$0x3] %vm376_vm9, %v670_v29  ;;  %v677_v30 = vmul.f32 (!%p820_p7), 0.00390625, %v676_v11 }
 0x132   : > { %678 = vst.msk [vmem:[#allocation8] sm:$0x3] %vm376_vm9, %v677_v30 }
 0x133   : > { %v679_v26 = vld [vmem:[#allocation3] sm:$0x3] }
 0x134   : > { %680 = vst.msk [vmem:[#allocation9] sm:$0x3] %vm376_vm9, %v679_v26 }
 0x137   : > { %v681_v21 = vld [vmem:[#allocation4] sm:$0x3] }
 0x138   : > { %v682_v31 = vmul.f32 0.00390625, %v681_v21 }
 0x13a   : > { %910 = vlog2.f32 %v682_v31 }
 0x144   : > { %v911_v32 = vpop.eup %910 }
 0x145   : > { %v684_v33 = vmul.f32 0.6931472, %v911_v32 }
 0x147   : > { %v685_v34 = vmul.f32 0.33333334, %v684_v33 }
 0x149   : > { %v686_v35 = vmul.f32 1.442695, %v685_v34 }
 0x14b   : > { %912 = vpow2.f32 %v686_v35 }
 0x155   : > { %v913_v36 = vpop.eup %912 }
 0x156   : > { %688 = vst.msk [vmem:[#allocation11] sm:$0x3] %vm376_vm9, %v913_v36 }
 0x157 PF: > { %p1418_p9 = scmp.eq.s32.totalorder %s812_s18, 1  ;;  %s1088_s23 = smov [#allocation9]  }
 0x158   : > { %s711_s30 = sshll.u32 %s1088_s23, 4  ;;  %s712_s30 = int_to_ptr.vmem [resolvable:$true] %s711_s30 }
 0x159   : > { %s944_s5 = scalar_lea.vmem %s712_s30, 32  ;;  %p951_p11 = scmp.lt.s32.totalorder %s712_s30, %s712_s30 }
 0x15a   : > { %p945_p5 = scmp.ne.s32.totalorder %s712_s30, %s944_s5  ;;  %p952_p13 = scmp.lt.s32.totalorder %s944_s5, %s944_s5 }
 0x15c   : > { %p946_p6 = pnand %p945_p5, %p1418_p9  ;;  %p953_p1 = por %p952_p13, %p951_p11 }
 0x15e   : > { %p947_p8 = pneg %p946_p6 }
 0x160   : > { %p954_p2 = pnand %p953_p1, %p947_p8 }
 0x162   : > { %957 = shalt.err (!%p954_p2)
}
 0x163   : > { %s958_s18 = scalar_lea.hbm %s1504_s2, 32 }
 0x164   : > { %p959_p3 = scmp.ne.s32.totalorder %s1504_s2, %s958_s18  ;;  %p964_p4 = scmp.lt.u32.totalorder %s958_s18, %s1504_s2 }
 0x166   : > { %p960_p12 = pnand %p959_p3, %p1418_p9 }
 0x168   : > { %p961_p0 = pneg %p960_p12 }
 0x16a   : > { %p966_p10 = pnand %p964_p4, %p961_p0 }
 0x16c   : > { %969 = shalt.err (!%p966_p10)
}
 0x16d   : > { %834 = dma.vmem_to_hbm [thread:$0]  (%p1418_p9), %s712_s30, 32, %s1504_s2, [#allocation10]  }
 0x16e   : > { %s1089_s26 = smov [#allocation8]   ;;  %s1090_s28 = smov [#allocation11]  }
 0x16f   : > { %s698_s27 = sshll.u32 %s1089_s26, 4  ;;  %s724_s29 = sshll.u32 %s1090_s28, 4  ;;  %s699_s27 = int_to_ptr.vmem [resolvable:$true] %s698_s27  ;;  %s725_s29 = int_to_ptr.vmem [resolvable:$true] %s724_s29 }
 0x170   : > { %s970_s4 = scalar_lea.vmem %s699_s27, 32  ;;  %p977_p8 = scmp.lt.s32.totalorder %s699_s27, %s699_s27 }
 0x171   : > { %p971_p7 = scmp.ne.s32.totalorder %s699_s27, %s970_s4  ;;  %p978_p11 = scmp.lt.s32.totalorder %s970_s4, %s970_s4 }
 0x173   : > { %p972_p5 = pnand %p971_p7, %p1418_p9  ;;  %p979_p13 = por %p978_p11, %p977_p8 }
 0x175   : > { %p973_p6 = pneg %p972_p5 }
 0x177   : > { %p980_p1 = pnand %p979_p13, %p973_p6 }
 0x179   : > { %983 = shalt.err (!%p980_p1)
}
 0x17a   : > { %s984_s10 = scalar_lea.hbm %s1503_s1, 32 }
 0x17b   : > { %p985_p2 = scmp.ne.s32.totalorder %s1503_s1, %s984_s10  ;;  %p990_p0 = scmp.lt.u32.totalorder %s984_s10, %s1503_s1 }
 0x17d   : > { %p986_p3 = pnand %p985_p2, %p1418_p9 }
 0x17f   : > { %p987_p12 = pneg %p986_p3 }
 0x181   : > { %p992_p4 = pnand %p990_p0, %p987_p12 }
 0x183   : > { %995 = shalt.err (!%p992_p4)
}
 0x184   : > { %832 = dma.vmem_to_hbm [thread:$0]  (%p1418_p9), %s699_s27, 32, %s1503_s1, [#allocation7]  }
 0x185   : > { %s996_s11 = scalar_lea.vmem %s725_s29, 32  ;;  %p1003_p6 = scmp.lt.s32.totalorder %s725_s29, %s725_s29 }
 0x186   : > { %p997_p10 = scmp.ne.s32.totalorder %s725_s29, %s996_s11  ;;  %p1004_p8 = scmp.lt.s32.totalorder %s996_s11, %s996_s11 }
 0x188   : > { %p998_p7 = pnand %p997_p10, %p1418_p9  ;;  %p1005_p11 = por %p1004_p8, %p1003_p6 }
 0x18a   : > { %p999_p5 = pneg %p998_p7 }
 0x18c   : > { %p1006_p13 = pnand %p1005_p11, %p999_p5 }
 0x18e   : > { %1009 = shalt.err (!%p1006_p13)
}
 0x18f   : > { %s1010_s21 = scalar_lea.hbm %s1505_s3, 32 }
 0x190   : > { %p1011_p1 = scmp.ne.s32.totalorder %s1505_s3, %s1010_s21  ;;  %p1016_p12 = scmp.lt.u32.totalorder %s1010_s21, %s1505_s3 }
 0x192   : > { %p1012_p2 = pnand %p1011_p1, %p1418_p9 }
 0x194   : > { %p1013_p3 = pneg %p1012_p2 }
 0x196   : > { %p1018_p0 = pnand %p1016_p12, %p1013_p3 }
 0x198   : > { %1021 = shalt.err (!%p1018_p0)
}
 0x199   : > { %836 = dma.vmem_to_hbm [thread:$0]  (%p1418_p9), %s725_s29, 32, %s1505_s3, [#allocation10]  }
 0x19a   : > { %1051 = dma.done.wait (%p1418_p9), [#allocation7], 32  }
 0x19b   : > { %1053 = vsyncadd (%p1418_p9), [#allocation7], 4294967264 }
 0x19c   : > { %1055 = dma.done.wait (%p1418_p9), [#allocation10], 64  }
 0x19d   : > { %1057 = vsyncadd (%p1418_p9), [#allocation10], 4294967232 }
 0x19e PF: > { %s19_s17 = sadd.s32 1, %s1080_s17   ;;  %s1511_s12 = smov %s1064_s13 }
 0x19f   : > { %p16_p4 = scmp.ge.s32.totalorder %s19_s17, 4   ;;  %s1512_s13 = smov %s1068_s14 }
 0x1a0   : > { %s1513_s14 = smov %s1162_s24  ;;  %s1514_s15 = smov %s1076_s16 }
 0x1a1   : > { %s1515_s16 = smov %s1517_s19  ;;  %18 = sbr.rel (!%p16_p4) target bundleno = 6 (0x6), region = 88 }
 0x1a8   :  { %745 = vsyncpa [#allocation6], 1 }
 0x1a9   :  { %747 = vsyncpa [#allocation6 + $0x1], 1 }
 0x1aa   :  { %748 = vsyncpa [#allocation7], 1 }
 0x1ab   :  { %750 = vsyncpa [#allocation7 + $0x1], 1 }
 0x1ac   :  { %751 = vsyncpa [#allocation10], 1 }

</bundles_post_ra>
